<compile_context>
chip_gen: v7x
topology: tpu7x:2x2x1
jax: 0.10.0
libtpu: 0.0.40
codegen_flags: <defaults>
</compile_context>

<pallas_src>
import functools

import jax
import jax.numpy as jnp
from jax.experimental import pallas as pl
from jax.experimental.pallas import tpu as pltpu

_SUB = 8  # vreg sublane count (f32)


def _round_up(x, m):
    return ((x + m - 1) // m) * m


def _mlp_forward_kernel(x_ref, w1_ref, b1_ref, w2_ref, b2_ref, o_ref):
    """Fused 2-layer MLP forward on one TM-row tile: tanh(x@W1+b1)@W2+b2."""
    x = x_ref[...]                                                     # [TM, D_in]
    h = jnp.dot(x, w1_ref[...], preferred_element_type=jnp.float32)   # MXU
    h = jnp.tanh(h + b1_ref[...])                                      # VPU + EUP
    y = jnp.dot(h, w2_ref[...], preferred_element_type=jnp.float32)   # MXU
    o_ref[...] = (y + b2_ref[...]).astype(o_ref.dtype)


@functools.partial(jax.jit, static_argnames=("tm",))
def sktorch_forward(query, w1, b1, w2, b2, *, tm=8192):
    """Pallas wrapper: batch-tiled fused MLP forward (no lane/batch padding)."""
    n, d_in = query.shape
    h_dim = w1.shape[1]
    d_out = w2.shape[1]

    q = query.astype(jnp.float32)
    w1 = w1.astype(jnp.float32)
    b1 = b1.reshape(1, h_dim).astype(jnp.float32)
    w2 = w2.astype(jnp.float32)
    b2 = b2.reshape(1, d_out).astype(jnp.float32)

    # Batch tile: multiple of 8 sublanes.  For large batches cap at ~N/2 so
    # the grid has >= 2 steps and the "parallel" axis can shard across both
    # TensorCores on v7x.  Small batches get a single full-extent tile.
    tm_cap = _round_up(tm, _SUB)
    if n > 1024:
        tm_eff = min(tm_cap, _round_up(pl.cdiv(n, 2), _SUB))
    else:
        tm_eff = min(tm_cap, _round_up(n, _SUB))
    grid = (pl.cdiv(n, tm_eff),)

    # Honest (unpadded) scheduler hint.
    cost = pl.CostEstimate(
        flops=2 * n * (d_in * h_dim + h_dim * d_out),
        transcendentals=n * h_dim,
        bytes_accessed=4 * (n * d_in + n * d_out
                            + d_in * h_dim + h_dim * d_out + h_dim + d_out),
    )

    out = pl.pallas_call(
        _mlp_forward_kernel,
        out_shape=jax.ShapeDtypeStruct((n, d_out), jnp.float32),
        grid=grid,
        in_specs=[
            # Query streams in TM-row tiles along the batch grid axis; last
            # dim d_in is full-extent (no 128-lane padding needed).
            pl.BlockSpec((tm_eff, d_in), lambda i: (i, 0)),
            # Weights / biases: constant index_map -> VMEM-resident.
            pl.BlockSpec((d_in, h_dim), lambda i: (0, 0)),
            pl.BlockSpec((1, h_dim), lambda i: (0, 0)),
            pl.BlockSpec((h_dim, d_out), lambda i: (0, 0)),
            pl.BlockSpec((1, d_out), lambda i: (0, 0)),
        ],
        out_specs=pl.BlockSpec((tm_eff, d_out), lambda i: (i, 0)),
        compiler_params=pltpu.CompilerParams(
            dimension_semantics=("parallel",),  # shard batch axis across TCs (v7x)
        ),
        cost_estimate=cost,
    )(q, w1, b1, w2, b2)

    return out


def _torch_linear_init(key, fan_in, fan_out):
    """Deterministic PyTorch nn.Linear-style init: U(-1/sqrt(fan_in), +...)."""
    kw, kb = jax.random.split(key)
    bound = 1.0 / jnp.sqrt(jnp.float32(fan_in))
    w = jax.random.uniform(kw, (fan_in, fan_out), jnp.float32, -bound, bound)
    b = jax.random.uniform(kb, (1, fan_out), jnp.float32, -bound, bound)
    return w, b


def _reference_forward(query, w1, b1, w2, b2):
    h = jnp.tanh(query @ w1 + b1)
    return h @ w2 + b2


if __name__ == "__main__":
    # Small shapes consistent with a regression "query" matrix.
    N, D_IN, H, D_OUT = 8, 32, 64, 8

    root = jax.random.PRNGKey(0)
    k_x, _ = jax.random.split(root)
    # random_state=42 in the module -> deterministic weight init seed.
    # TODO(synk): jax.random.PRNGKey(42) does not reproduce torch.manual_seed(42)'s
    # nn.Linear stream; init is PyTorch-style but not bit-identical.
    k_params = jax.random.PRNGKey(42)
    k1, k2 = jax.random.split(k_params)

    query = jax.random.normal(k_x, (N, D_IN), jnp.float32)
    w1, b1 = _torch_linear_init(k1, D_IN, H)
    w2, b2 = _torch_linear_init(k2, H, D_OUT)

    out = sktorch_forward(query, w1, b1, w2, b2)
    out = jax.block_until_ready(out)

    ref = _reference_forward(query, w1, b1, w2, b2)
    assert out.shape == (N, D_OUT), f"bad shape {out.shape}"
    assert jnp.allclose(out, ref, atol=1e-5, rtol=1e-5), "mismatch vs reference"

    # Multi-tile batch: exercises the ragged last block and the >=2-step grid.
    N_BIG = 3000
    big_query = jax.random.normal(jax.random.PRNGKey(7), (N_BIG, D_IN), jnp.float32)
    big_out = jax.block_until_ready(sktorch_forward(big_query, w1, b1, w2, b2))
    big_ref = _reference_forward(big_query, w1, b1, w2, b2)
    assert big_out.shape == (N_BIG, D_OUT)
    assert jnp.allclose(big_out, big_ref, atol=1e-4, rtol=1e-4), "big-batch mismatch"

    print("KERNEL_OK")
</pallas_src>

<mosaic_0001>
module attributes {stable_mosaic.version = 11 : i64} {
  func.func @_mlp_forward_kernel(%arg0: i32, %arg1: memref<8x32xf32, #tpu.memory_space<vmem>>, %arg2: memref<32x64xf32, #tpu.memory_space<vmem>>, %arg3: memref<1x64xf32, #tpu.memory_space<vmem>>, %arg4: memref<64x8xf32, #tpu.memory_space<vmem>>, %arg5: memref<1x8xf32, #tpu.memory_space<vmem>>, %arg6: memref<8x8xf32, #tpu.memory_space<vmem>>) attributes {dimension_semantics = [#tpu.dimension_semantics<parallel>], iteration_bounds = array<i64: 1>, scalar_prefetch = 0 : i64, scratch_operands = 0 : i64, tpu.core_type = #tpu.core_type<tc>, window_params = [{transform_indices = @transform_0, window_bounds = array<i64: 8, 32>}, {pipeline_mode = #tpu.pipeline_mode<synchronous>, transform_indices = @transform_1, window_bounds = array<i64: 32, 64>}, {pipeline_mode = #tpu.pipeline_mode<synchronous>, transform_indices = @transform_2, window_bounds = array<i64: 1, 64>}, {pipeline_mode = #tpu.pipeline_mode<synchronous>, transform_indices = @transform_3, window_bounds = array<i64: 64, 8>}, {pipeline_mode = #tpu.pipeline_mode<synchronous>, transform_indices = @transform_4, window_bounds = array<i64: 1, 8>}, {transform_indices = @transform_5, window_bounds = array<i64: 8, 8>}]} {
    %c0 = arith.constant 0 : index
    %c0_0 = arith.constant 0 : index
    %0 = vector.load %arg1[%c0, %c0_0] : memref<8x32xf32, #tpu.memory_space<vmem>>, vector<8x32xf32>
    %c0_1 = arith.constant 0 : index
    %c0_2 = arith.constant 0 : index
    %1 = vector.load %arg2[%c0_1, %c0_2] : memref<32x64xf32, #tpu.memory_space<vmem>>, vector<32x64xf32>
    %cst = arith.constant dense<0.000000e+00> : vector<8x64xf32>
    %2 = tpu.matmul %0, %1, %cst {dimension_numbers = #tpu.dot_dimension_numbers<[1], [0], [0], [1], [0, 0, 1, 1], [], []>} : vector<8x32xf32>, vector<32x64xf32>, vector<8x64xf32> -> vector<8x64xf32>
    %c0_3 = arith.constant 0 : index
    %c0_4 = arith.constant 0 : index
    %3 = vector.load %arg3[%c0_3, %c0_4] : memref<1x64xf32, #tpu.memory_space<vmem>>, vector<1x64xf32>
    %4 = vector.broadcast %3 : vector<1x64xf32> to vector<8x64xf32>
    %5 = arith.addf %2, %4 : vector<8x64xf32>
    %6 = math.tanh %5 : vector<8x64xf32>
    %c0_5 = arith.constant 0 : index
    %c0_6 = arith.constant 0 : index
    %7 = vector.load %arg4[%c0_5, %c0_6] : memref<64x8xf32, #tpu.memory_space<vmem>>, vector<64x8xf32>
    %cst_7 = arith.constant dense<0.000000e+00> : vector<8x8xf32>
    %8 = tpu.matmul %6, %7, %cst_7 {dimension_numbers = #tpu.dot_dimension_numbers<[1], [0], [0], [1], [0, 0, 1, 1], [], []>} : vector<8x64xf32>, vector<64x8xf32>, vector<8x8xf32> -> vector<8x8xf32>
    %c0_8 = arith.constant 0 : index
    %c0_9 = arith.constant 0 : index
    %9 = vector.load %arg5[%c0_8, %c0_9] : memref<1x8xf32, #tpu.memory_space<vmem>>, vector<1x8xf32>
    %10 = vector.broadcast %9 : vector<1x8xf32> to vector<8x8xf32>
    %11 = arith.addf %8, %10 : vector<8x8xf32>
    %c0_10 = arith.constant 0 : index
    %c0_11 = arith.constant 0 : index
    %12 = vector.load %arg6[%c0_10, %c0_11] : memref<8x8xf32, #tpu.memory_space<vmem>>, vector<8x8xf32>
    tpu.vector_store %arg6[%c0_10, %c0_11], %11 {strides = array<i32>} : memref<8x8xf32, #tpu.memory_space<vmem>>, vector<8x8xf32>,
    return
  }
  func.func @transform_0(%arg0: i32) -> (i32, i32) {
    %c0_i32 = arith.constant 0 : i32
    %c0_i32_0 = arith.constant 0 : i32
    return %arg0, %c0_i32 : i32, i32
  }
  func.func @transform_1(%arg0: i32) -> (i32, i32) {
    %c0_i32 = arith.constant 0 : i32
    %c0_i32_0 = arith.constant 0 : i32
    %c0_i32_1 = arith.constant 0 : i32
    return %c0_i32, %c0_i32_0 : i32, i32
  }
  func.func @transform_2(%arg0: i32) -> (i32, i32) {
    %c0_i32 = arith.constant 0 : i32
    %c0_i32_0 = arith.constant 0 : i32
    %c0_i32_1 = arith.constant 0 : i32
    return %c0_i32, %c0_i32_0 : i32, i32
  }
  func.func @transform_3(%arg0: i32) -> (i32, i32) {
    %c0_i32 = arith.constant 0 : i32
    %c0_i32_0 = arith.constant 0 : i32
    %c0_i32_1 = arith.constant 0 : i32
    return %c0_i32, %c0_i32_0 : i32, i32
  }
  func.func @transform_4(%arg0: i32) -> (i32, i32) {
    %c0_i32 = arith.constant 0 : i32
    %c0_i32_0 = arith.constant 0 : i32
    %c0_i32_1 = arith.constant 0 : i32
    return %c0_i32, %c0_i32_0 : i32, i32
  }
  func.func @transform_5(%arg0: i32) -> (i32, i32) {
    %c0_i32 = arith.constant 0 : i32
    %c0_i32_0 = arith.constant 0 : i32
    return %arg0, %c0_i32 : i32, i32
  }
}

</mosaic_0001>

<bundles_post_ra>
// kernel: sktorch_forward.1
= control target key start
LH: loop header
LB: loop body
LE: loop exit
PB: predicated region body
PF: predicated region fallthrough
CT: control target
= control target key end

     0   :  { %v309_v3 = vmov 0.0|0.0   ;;  %vm310_vm0 = vmmov 0   ;;  %v311_v6 = vmov 0.0   ;;  %s400_s0 = inlined_call_operand.vmem [shape: f32[8,32], index: 0, kind: input, shape index: {}]   ;;  %s401_s1 = inlined_call_operand.vmem [shape: f32[32,64], index: 1, kind: input, shape index: {}]   ;;  %s402_s2 = inlined_call_operand.vmem [shape: f32[1,64], index: 2, kind: input, shape index: {}]   ;;  %s403_s3 = inlined_call_operand.vmem [shape: f32[64,8], index: 3, kind: input, shape index: {}]   ;;  %s404_s4 = inlined_call_operand.vmem [shape: f32[1,8], index: 4, kind: input, shape index: {}]   ;;  %s405_s5 = inlined_call_operand.hbm [shape: f32[8,8], index: 5, kind: output, shape index: {}]  }
   0x1   :  { %v22_v0 = vld [vmem:[%s401_s1] sm:$0xff]  ;;  %v23_v1 = vld [vmem:[%s401_s1 + $0x8] sm:$0xff]  ;;  %v24_v2 = vld [vmem:[%s401_s1 + $0x10] sm:$0xff]  ;;  %261 = vmatprep.subr.bf16.mxu0 %v309_v3  ;;  %239 = vmatprep.mubr.msk.f32.mxu0 %vm310_vm0, %v311_v6 }
   0x2   :  { %v262_v4 = vpack.c.bf16 %v23_v1, %v22_v0  ;;  %v25_v5 = vld [vmem:[%s401_s1 + $0x18] sm:$0xff]  ;;  %v108_v7 = vld [vmem:[%s403_s3] sm:$0xff]  ;;  %267 = vmatprep.subr.bf16.mxu1 %v309_v3  ;;  %v109_v8 = vld [vmem:[%s403_s3 + $0x8] sm:$0xff]  ;;  %258 = vmatprep.mubr.msk.f32.mxu1 %vm310_vm0, %v311_v6 }
   0x3   :  { %10 = vsyncpa [#allocation3], 0  ;;  %v265_v9 = vpack.c.bf16 %v25_v5, %v24_v2  ;;  %v268_v10 = vpack.c.bf16 %v109_v8, %v108_v7  ;;  %v21_v11 = vld [vmem:[%s400_s0] sm:$0xff]  ;;  %vm33_vm1 = vcmask 261120   ;;  %v110_v12 = vld [vmem:[%s403_s3 + $0x10] sm:$0xff]  ;;  %vm123_vm2 = vcmask 523264  }
   0x4   :  { %263 = vmatpush3.bf16.msra.mxu0 %v262_v4  ;;  %v111_v13 = vld [vmem:[%s403_s3 + $0x18] sm:$0xff]  ;;  %v112_v15 = vld [vmem:[%s403_s3 + $0x20] sm:$0xff]  ;;  %v113_v16 = vld [vmem:[%s403_s3 + $0x28] sm:$0xff]  ;;  %vm197_vm3 = vcmask 64512  }
   0x5   :  { %264 = vmatprep.subr.bf16.mxu0 %v309_v3  ;;  %269 = vmatpush3.bf16.msra.mxu1 %v268_v10  ;;  %v271_v14 = vpack.c.bf16 %v111_v13, %v110_v12  ;;  %v274_v17 = vpack.c.bf16 %v113_v16, %v112_v15  ;;  %v114_v18 = vld [vmem:[%s403_s3 + $0x30] sm:$0xff]  ;;  %v115_v19 = vld [vmem:[%s403_s3 + $0x38] sm:$0xff]  ;;  %v213_v21 = vld [vmem:[%s402_s2] ss:$0 sm:$0xff]  ;;  %s312_s3 = smov [#allocation2]  }
   0x6   :  { %270 = vmatprep.subr.bf16.mxu1 %v309_v3  ;;  %v277_v20 = vpack.c.bf16 %v115_v19, %v114_v18  ;;  %v215_v26 = vld [vmem:[%s404_s4] ss:$0 sm:$0xff]  ;;  %s205_s21 = sshll.u32 %s312_s3, 4  ;;  %s206_s21 = int_to_ptr.vmem [resolvable:$true] %s205_s21 }
   0x7   :  { %s285_s2 = scalar_lea.vmem %s206_s21, 128  ;;  %p290_p1 = scmp.lt.s32.totalorder %s206_s21, %s206_s21 }
   0x8   :  { %266 = vmatpush3.bf16.msra.mxu0 %v265_v9  ;;  %p286_p0 = scmp.ne.s32.totalorder %s206_s21, %s285_s2  ;;  %p291_p2 = scmp.lt.s32.totalorder %s285_s2, %s285_s2 }
   0x9   :  { %272 = vmatpush3.bf16.msra.mxu1 %v271_v14 }
   0xa   :  { %273 = vmatprep.subr.bf16.mxu1 %v309_v3  ;;  %p292_p3 = por %p291_p2, %p290_p1 }
   0xb   :  { %240 = vmatmul.mubr.msk.f32.vlgmr.msra.gmra.mrb[0].mxu0 %vm33_vm1, %v21_v11 }
   0xc   :  { %p293_p4 = pnand %p292_p3, %p286_p0 }
   0xd   :  { %275 = vmatpush3.bf16.msra.mxu1 %v274_v17 }
   0xe   :  { %276 = vmatprep.subr.bf16.mxu1 %v309_v3 }
  0x11   :  { %278 = vmatpush3.bf16.msra.mxu1 %v277_v20 }
  0xde   :  { %v103_v22 = vpop.f32.mrb[0].mxu0 }
  0xdf   :  { %v104_v23 = vadd.f32 %v213_v21, %v103_v22  ;;  %v241_v24 = vpop.f32.mrb[1].mxu0 }
  0xe1   :  { %283 = vtanh.f32 %v104_v23 }
  0xeb   :  { %v284_v25 = vpop.eup %283 }
  0xec   :  { %259 = vmatmul.mubr.msk.f32.vlgmr.msra.gmra.mrb[0].mxu1 %vm123_vm2, %v284_v25 }
 0x1bf   :  { %v193_v27 = vpop.f32.mrb[0].mxu1 }
 0x1c0   :  { %v194_v28 = vadd.f32 %v215_v26, %v193_v27  ;;  %v260_v29 = vpop.f32.mrb[1].mxu1 }
 0x1c2   :  { %198 = vst.msk [vmem:[#allocation2] sm:$0xff] %vm197_vm3, %v194_v28 }
 0x1c3   :  { %296 = shalt.err (!%p293_p4)
}
 0x1c4   :  { %s297_s24 = scalar_lea.hbm %s405_s5, 128 }
 0x1c5   :  { %p298_p5 = scmp.ne.s32.totalorder %s405_s5, %s297_s24  ;;  %p301_p6 = scmp.lt.u32.totalorder %s297_s24, %s405_s5 }
 0x1c7   :  { %p303_p7 = pnand %p301_p6, %p298_p5 }
 0x1c9   :  { %306 = shalt.err (!%p303_p7)
}
 0x1ca   :  { %208 = dma.vmem_to_hbm [thread:$0]  %s206_s21, 128, %s405_s5, [#allocation3]  }
 0x1cb   :  { %307 = dma.done.wait [#allocation3], 128  }
 0x1cc   :  { %308 = vsyncadd [#allocation3], 4294967168 }
 0x1cd   :  { %212 = vsyncpa [#allocation3], 1 }

</bundles_post_ra>
